<compile_context>
chip_gen: v7x
topology: tpu7x:2x2x1
jax: 0.10.0
libtpu: 0.0.40
codegen_flags: <defaults>
</compile_context>

<pallas_src>
import functools

import jax
import jax.numpy as jnp
import numpy as np
from jax.experimental import pallas as pl
from jax.experimental.pallas import tpu as pltpu


# ----------------------------- Pallas kernels ------------------------------

def _sum_prod_kernel(lw_ref, x_ref, o_ref):
    # lw_ref: (TO, C_in, K, TP)  log_softmax'd weights (resident across inner N axis)
    # x_ref : (1,  C_in, K, TP)  per-batch log-likelihood tile
    # o_ref : (1,  TO,      TP)
    x = x_ref[0].astype(jnp.float32)                           # (C_in, K, TP)
    to = o_ref.shape[1]
    for t in range(to):                                        # static unroll over out-channel chunk
        z = x + lw_ref[t].astype(jnp.float32)                  # (C_in, K, TP)
        zm = jnp.max(z, axis=0, keepdims=True)                 # (1, K, TP)
        s = jnp.log(jnp.sum(jnp.exp(z - zm), axis=0)) + zm[0]  # (K, TP)  logsumexp over C_in
        # ProdConv: sum-pool over the K window pixels.
        o_ref[0, t:t + 1] = jnp.sum(s, axis=0, keepdims=True).astype(o_ref.dtype)


def _prod_sum_kernel(lw_ref, x_ref, o_ref):
    # x was already sum-pooled over the K window pixels in the wrapper.
    # lw_ref: (TO, C_in, TP)   x_ref: (1, C_in, TP)   o_ref: (1, TO, TP)
    x = x_ref[0].astype(jnp.float32)                           # (C_in, TP)
    to = o_ref.shape[1]
    for t in range(to):
        z = x + lw_ref[t].astype(jnp.float32)                  # (C_in, TP)
        zm = jnp.max(z, axis=0, keepdims=True)                 # (1, TP)
        s = jnp.log(jnp.sum(jnp.exp(z - zm), axis=0, keepdims=True)) + zm
        o_ref[0, t:t + 1] = s.astype(o_ref.dtype)


# ------------------------------- glue / wrapper -----------------------------

def _to_kp(a, kh, kw):
    """(..., H, W) -> (..., Kh*Kw, (H//Kh)*(W//Kw))  (window pixels, out pixels)."""
    lead = a.shape[:-2]
    H, W = a.shape[-2:]
    Ho, Wo = H // kh, W // kw
    a = a.reshape(lead + (Ho, kh, Wo, kw))
    nd = a.ndim
    perm = tuple(range(nd - 4)) + (nd - 3, nd - 1, nd - 4, nd - 2)  # (..., Kh, Kw, Ho, Wo)
    a = jnp.transpose(a, perm)
    return a.reshape(lead + (kh * kw, Ho * Wo))


def _ceil8(v):
    return -(-v // 8) * 8


def _pick_out_tile(c_out, cap=8):
    """Largest multiple of 8 dividing c_out (<= cap); else the full c_out."""
    best = None
    t = 8
    while t <= min(cap, c_out):
        if c_out % t == 0:
            best = t
        t += 8
    return best if best is not None else c_out


def _pick_lane_tile(p, per_lane_bytes, budget_bytes=12 * 2**20, cap=4096):
    """Largest multiple-of-128 divisor of p fitting the VMEM budget; else full p."""
    if p % 128 != 0:
        return p
    best = 128
    max_lanes = max(128, budget_bytes // max(per_lane_bytes, 1))
    t = 128
    while t <= min(p, cap):
        if p % t == 0 and t <= max_lanes:
            best = t
        t += 128
    return best


@functools.partial(jax.jit, static_argnames=("kernel_size_h", "kernel_size_w", "order"))
def sum_prod_layer_forward(x, logits, *, kernel_size_h, kernel_size_w, order="sum-prod"):
    """Pallas forward of SumProdLayer.

    x:      (N, C_in, H, W)           (NCHW, like PyTorch)
    logits: (C_out, C_in, H, W)             if order == 'sum-prod'
            (C_out, C_in, H//Kh, W//Kw)     if order == 'prod-sum'
    returns (N, C_out, H//Kh, W//Kw)
    """
    Kh, Kw = kernel_size_h, kernel_size_w
    N, C_in, H, W = x.shape
    C_out = logits.shape[0]
    assert H % Kh == 0 and W % Kw == 0
    Ho, Wo = H // Kh, W // Kw
    K, P = Kh * Kw, Ho * Wo

    # Hoisted: mixture weights are batch-independent, so compute log_softmax once
    # here instead of once per (n, c_out) grid step inside the kernel.
    lw = jax.nn.log_softmax(logits.astype(jnp.float32), axis=1)

    TO = _pick_out_tile(C_out)

    if order == "sum-prod":
        # TODO(synk): the NCHW -> (C, K, P) relayout of x is still a separate XLA
        # pass over HBM; for very large H*W it could be folded into the kernel by
        # indexing NCHW windows directly.
        x_r = _to_kp(x, Kh, Kw)                               # (N, C_in, K, P)
        lw_r = _to_kp(lw, Kh, Kw)                             # (C_out, C_in, K, P)
        per_lane = 4 * 2 * ((TO + 1) * C_in * _ceil8(K) + _ceil8(TO))
        TP = _pick_lane_tile(P, per_lane)
        kernel = _sum_prod_kernel
        lw_spec = pl.BlockSpec((TO, C_in, K, TP), lambda o, p, n: (o, 0, 0, p))
        x_spec = pl.BlockSpec((1, C_in, K, TP), lambda o, p, n: (n, 0, 0, p))
    elif order == "prod-sum":
        # ProdConv (sum-pool) hoisted to the wrapper: the kernel's x input and its
        # DMA shrink by Kh*Kw.
        xp = x.reshape(N, C_in, Ho, Kh, Wo, Kw).sum(axis=(3, 5))
        x_r = xp.reshape(N, C_in, P)                          # (N, C_in, P)
        lw_r = lw.reshape(C_out, C_in, P)                     # (C_out, C_in, P)
        per_lane = 4 * 2 * ((TO + 1) * _ceil8(C_in) + _ceil8(TO))
        TP = _pick_lane_tile(P, per_lane)
        kernel = _prod_sum_kernel
        lw_spec = pl.BlockSpec((TO, C_in, TP), lambda o, p, n: (o, 0, p))
        x_spec = pl.BlockSpec((1, C_in, TP), lambda o, p, n: (n, 0, p))
    else:
        raise ValueError(f"Order {order} not supported")

    vmem_limit = int(min(64 * 2**20, max(32 * 2**20, 2 * per_lane * TP)))

    out = pl.pallas_call(
        kernel,
        out_shape=jax.ShapeDtypeStruct((N, C_out, P), x.dtype),
        grid_spec=pltpu.PrefetchScalarGridSpec(
            num_scalar_prefetch=0,
            # (C_out tiles, P tiles, N): the lw block index is invariant across the
            # innermost N axis, so the larger weight tile stays resident in VMEM
            # and only the small per-batch x tile is streamed each step.
            grid=(C_out // TO, P // TP, N),
            in_specs=[lw_spec, x_spec],
            out_specs=pl.BlockSpec((1, TO, TP), lambda o, p, n: (n, o, p)),
        ),
        compiler_params=pltpu.CompilerParams(
            dimension_semantics=("parallel", "parallel", "arbitrary"),
            vmem_limit_bytes=vmem_limit),
    )(lw_r, x_r)

    return out.reshape(N, C_out, Ho, Wo)


# ------------------------------ pure-JAX reference ---------------------------

def _reference(x, logits, kh, kw, order):
    lw = jax.nn.log_softmax(logits, axis=1)
    if order == "sum-prod":
        y = jax.nn.logsumexp(x[:, None] + lw[None], axis=2)   # (N, Co, H, W)
        N, Co, H, W = y.shape
        y = y.reshape(N, Co, H // kh, kh, W // kw, kw).sum(axis=(3, 5))
    else:
        N, C, H, W = x.shape
        xp = x.reshape(N, C, H // kh, kh, W // kw, kw).sum(axis=(3, 5))
        y = jax.nn.logsumexp(xp[:, None] + lw[None], axis=2)
    return y


# ------------------------------------ main ----------------------------------

if __name__ == "__main__":
    # Small shapes consistent with the module (log-likelihood maps, NCHW).
    N, C_in, C_out = 2, 4, 8
    H = W = 16
    Kh = Kw = 2

    key = jax.random.PRNGKey(0)
    kx, kl1, kl2 = jax.random.split(key, 3)

    # x acts as per-channel log-likelihoods (negative values, like real inputs).
    x = -jnp.abs(jax.random.normal(kx, (N, C_in, H, W), dtype=jnp.float32))

    # Deterministic parameter init, mirroring torch.log(torch.rand(...)).
    logits_sp = jnp.log(jax.random.uniform(
        kl1, (C_out, C_in, H, W), dtype=jnp.float32, minval=1e-3, maxval=1.0))
    logits_ps = jnp.log(jax.random.uniform(
        kl2, (C_out, C_in, H // Kh, W // Kw), dtype=jnp.float32, minval=1e-3, maxval=1.0))

    # order = 'sum-prod' (default)
    y_sp = sum_prod_layer_forward(
        x, logits_sp, kernel_size_h=Kh, kernel_size_w=Kw, order="sum-prod")
    y_sp = jax.block_until_ready(y_sp)
    ref_sp = _reference(x, logits_sp, Kh, Kw, "sum-prod")
    np.testing.assert_allclose(np.asarray(y_sp), np.asarray(ref_sp), rtol=1e-5, atol=1e-5)

    # order = 'prod-sum'
    y_ps = sum_prod_layer_forward(
        x, logits_ps, kernel_size_h=Kh, kernel_size_w=Kw, order="prod-sum")
    y_ps = jax.block_until_ready(y_ps)
    ref_ps = _reference(x, logits_ps, Kh, Kw, "prod-sum")
    np.testing.assert_allclose(np.asarray(y_ps), np.asarray(ref_ps), rtol=1e-5, atol=1e-5)

    assert y_sp.shape == (N, C_out, H // Kh, W // Kw)
    assert y_ps.shape == (N, C_out, H // Kh, W // Kw)

    # TODO(synk): SumProdLayer.sample() (categorical index sampling over SamplingContext)
    # is control-flow heavy host-side logic and is not implemented as a Pallas kernel.
    print("KERNEL_OK")
</pallas_src>

<mosaic_0001>
module attributes {stable_mosaic.version = 11 : i64} {
  func.func @_sum_prod_kernel(%arg0: i32, %arg1: i32, %arg2: i32, %arg3: memref<8x4x4x64xf32, #tpu.memory_space<vmem>>, %arg4: memref<1x4x4x64xf32, #tpu.memory_space<vmem>>, %arg5: memref<1x8x64xf32, #tpu.memory_space<vmem>>) attributes {dimension_semantics = [#tpu.dimension_semantics<parallel>, #tpu.dimension_semantics<parallel>, #tpu.dimension_semantics<arbitrary>], iteration_bounds = array<i64: 1, 1, 2>, scalar_prefetch = 0 : i64, scratch_operands = 0 : i64, tpu.core_type = #tpu.core_type<tc>, window_params = [{transform_indices = @transform_0, window_bounds = array<i64: 8, 4, 4, 64>}, {transform_indices = @transform_1, window_bounds = array<i64: 1, 4, 4, 64>}, {transform_indices = @transform_2, window_bounds = array<i64: 1, 8, 64>}]} {
    %c0 = arith.constant 0 : index
    %c0_0 = arith.constant 0 : index
    %c0_1 = arith.constant 0 : index
    %c0_2 = arith.constant 0 : index
    %0 = vector.load %arg4[%c0, %c0_0, %c0_1, %c0_2] : memref<1x4x4x64xf32, #tpu.memory_space<vmem>>, vector<1x4x4x64xf32>
    %1 = vector.shape_cast %0 : vector<1x4x4x64xf32> to vector<4x4x64xf32>
    %c0_3 = arith.constant 0 : index
    %c0_4 = arith.constant 0 : index
    %c0_5 = arith.constant 0 : index
    %c0_6 = arith.constant 0 : index
    %2 = vector.load %arg3[%c0_3, %c0_4, %c0_5, %c0_6] : memref<8x4x4x64xf32, #tpu.memory_space<vmem>>, vector<1x4x4x64xf32>
    %3 = vector.shape_cast %2 : vector<1x4x4x64xf32> to vector<4x4x64xf32>
    %4 = arith.addf %1, %3 : vector<4x4x64xf32>
    %cst = arith.constant dense<0xFF800000> : vector<4x64xf32>
    %5 = vector.multi_reduction <maximumf>, %4, %cst [0] : vector<4x4x64xf32> to vector<4x64xf32>
    %6 = vector.shape_cast %5 : vector<4x64xf32> to vector<1x4x64xf32>
    %7 = vector.broadcast %6 : vector<1x4x64xf32> to vector<4x4x64xf32>
    %8 = arith.subf %4, %7 : vector<4x4x64xf32>
    %9 = math.exp %8 : vector<4x4x64xf32>
    %cst_7 = arith.constant dense<0.000000e+00> : vector<4x64xf32>
    %10 = vector.multi_reduction <add>, %9, %cst_7 [0] : vector<4x4x64xf32> to vector<4x64xf32>
    %11 = math.log %10 : vector<4x64xf32>
    %12 = vector.shape_cast %6 : vector<1x4x64xf32> to vector<4x64xf32>
    %13 = arith.addf %11, %12 : vector<4x64xf32>
    %cst_8 = arith.constant dense<0.000000e+00> : vector<64xf32>
    %14 = vector.multi_reduction <add>, %13, %cst_8 [0] : vector<4x64xf32> to vector<64xf32>
    %15 = vector.shape_cast %14 : vector<64xf32> to vector<1x64xf32>
    %c0_9 = arith.constant 0 : index
    %c0_10 = arith.constant 0 : index
    %c0_11 = arith.constant 0 : index
    %16 = vector.load %arg5[%c0_9, %c0_10, %c0_11] : memref<1x8x64xf32, #tpu.memory_space<vmem>>, vector<1x1x64xf32>
    %17 = vector.shape_cast %16 : vector<1x1x64xf32> to vector<1x64xf32>
    %18 = vector.shape_cast %15 : vector<1x64xf32> to vector<1x1x64xf32>
    tpu.vector_store %arg5[%c0_9, %c0_10, %c0_11], %18 {strides = array<i32>} : memref<1x8x64xf32, #tpu.memory_space<vmem>>, vector<1x1x64xf32>,
    %c1 = arith.constant 1 : index
    %c0_12 = arith.constant 0 : index
    %c0_13 = arith.constant 0 : index
    %c0_14 = arith.constant 0 : index
    %19 = vector.load %arg3[%c1, %c0_12, %c0_13, %c0_14] : memref<8x4x4x64xf32, #tpu.memory_space<vmem>>, vector<1x4x4x64xf32>
    %20 = vector.shape_cast %19 : vector<1x4x4x64xf32> to vector<4x4x64xf32>
    %21 = arith.addf %1, %20 : vector<4x4x64xf32>
    %cst_15 = arith.constant dense<0xFF800000> : vector<4x64xf32>
    %22 = vector.multi_reduction <maximumf>, %21, %cst_15 [0] : vector<4x4x64xf32> to vector<4x64xf32>
    %23 = vector.shape_cast %22 : vector<4x64xf32> to vector<1x4x64xf32>
    %24 = vector.broadcast %23 : vector<1x4x64xf32> to vector<4x4x64xf32>
    %25 = arith.subf %21, %24 : vector<4x4x64xf32>
    %26 = math.exp %25 : vector<4x4x64xf32>
    %cst_16 = arith.constant dense<0.000000e+00> : vector<4x64xf32>
    %27 = vector.multi_reduction <add>, %26, %cst_16 [0] : vector<4x4x64xf32> to vector<4x64xf32>
    %28 = math.log %27 : vector<4x64xf32>
    %29 = vector.shape_cast %23 : vector<1x4x64xf32> to vector<4x64xf32>
    %30 = arith.addf %28, %29 : vector<4x64xf32>
    %cst_17 = arith.constant dense<0.000000e+00> : vector<64xf32>
    %31 = vector.multi_reduction <add>, %30, %cst_17 [0] : vector<4x64xf32> to vector<64xf32>
    %32 = vector.shape_cast %31 : vector<64xf32> to vector<1x64xf32>
    %c0_18 = arith.constant 0 : index
    %c1_19 = arith.constant 1 : index
    %c0_20 = arith.constant 0 : index
    %33 = vector.load %arg5[%c0_18, %c1_19, %c0_20] : memref<1x8x64xf32, #tpu.memory_space<vmem>>, vector<1x1x64xf32>
    %34 = vector.shape_cast %33 : vector<1x1x64xf32> to vector<1x64xf32>
    %35 = vector.shape_cast %32 : vector<1x64xf32> to vector<1x1x64xf32>
    tpu.vector_store %arg5[%c0_18, %c1_19, %c0_20], %35 {strides = array<i32>} : memref<1x8x64xf32, #tpu.memory_space<vmem>>, vector<1x1x64xf32>,
    %c2 = arith.constant 2 : index
    %c0_21 = arith.constant 0 : index
    %c0_22 = arith.constant 0 : index
    %c0_23 = arith.constant 0 : index
    %36 = vector.load %arg3[%c2, %c0_21, %c0_22, %c0_23] : memref<8x4x4x64xf32, #tpu.memory_space<vmem>>, vector<1x4x4x64xf32>
    %37 = vector.shape_cast %36 : vector<1x4x4x64xf32> to vector<4x4x64xf32>
    %38 = arith.addf %1, %37 : vector<4x4x64xf32>
    %cst_24 = arith.constant dense<0xFF800000> : vector<4x64xf32>
    %39 = vector.multi_reduction <maximumf>, %38, %cst_24 [0] : vector<4x4x64xf32> to vector<4x64xf32>
    %40 = vector.shape_cast %39 : vector<4x64xf32> to vector<1x4x64xf32>
    %41 = vector.broadcast %40 : vector<1x4x64xf32> to vector<4x4x64xf32>
    %42 = arith.subf %38, %41 : vector<4x4x64xf32>
    %43 = math.exp %42 : vector<4x4x64xf32>
    %cst_25 = arith.constant dense<0.000000e+00> : vector<4x64xf32>
    %44 = vector.multi_reduction <add>, %43, %cst_25 [0] : vector<4x4x64xf32> to vector<4x64xf32>
    %45 = math.log %44 : vector<4x64xf32>
    %46 = vector.shape_cast %40 : vector<1x4x64xf32> to vector<4x64xf32>
    %47 = arith.addf %45, %46 : vector<4x64xf32>
    %cst_26 = arith.constant dense<0.000000e+00> : vector<64xf32>
    %48 = vector.multi_reduction <add>, %47, %cst_26 [0] : vector<4x64xf32> to vector<64xf32>
    %49 = vector.shape_cast %48 : vector<64xf32> to vector<1x64xf32>
    %c0_27 = arith.constant 0 : index
    %c2_28 = arith.constant 2 : index
    %c0_29 = arith.constant 0 : index
    %50 = vector.load %arg5[%c0_27, %c2_28, %c0_29] : memref<1x8x64xf32, #tpu.memory_space<vmem>>, vector<1x1x64xf32>
    %51 = vector.shape_cast %50 : vector<1x1x64xf32> to vector<1x64xf32>
    %52 = vector.shape_cast %49 : vector<1x64xf32> to vector<1x1x64xf32>
    tpu.vector_store %arg5[%c0_27, %c2_28, %c0_29], %52 {strides = array<i32>} : memref<1x8x64xf32, #tpu.memory_space<vmem>>, vector<1x1x64xf32>,
    %c3 = arith.constant 3 : index
    %c0_30 = arith.constant 0 : index
    %c0_31 = arith.constant 0 : index
    %c0_32 = arith.constant 0 : index
    %53 = vector.load %arg3[%c3, %c0_30, %c0_31, %c0_32] : memref<8x4x4x64xf32, #tpu.memory_space<vmem>>, vector<1x4x4x64xf32>
    %54 = vector.shape_cast %53 : vector<1x4x4x64xf32> to vector<4x4x64xf32>
    %55 = arith.addf %1, %54 : vector<4x4x64xf32>
    %cst_33 = arith.constant dense<0xFF800000> : vector<4x64xf32>
    %56 = vector.multi_reduction <maximumf>, %55, %cst_33 [0] : vector<4x4x64xf32> to vector<4x64xf32>
    %57 = vector.shape_cast %56 : vector<4x64xf32> to vector<1x4x64xf32>
    %58 = vector.broadcast %57 : vector<1x4x64xf32> to vector<4x4x64xf32>
    %59 = arith.subf %55, %58 : vector<4x4x64xf32>
    %60 = math.exp %59 : vector<4x4x64xf32>
    %cst_34 = arith.constant dense<0.000000e+00> : vector<4x64xf32>
    %61 = vector.multi_reduction <add>, %60, %cst_34 [0] : vector<4x4x64xf32> to vector<4x64xf32>
    %62 = math.log %61 : vector<4x64xf32>
    %63 = vector.shape_cast %57 : vector<1x4x64xf32> to vector<4x64xf32>
    %64 = arith.addf %62, %63 : vector<4x64xf32>
    %cst_35 = arith.constant dense<0.000000e+00> : vector<64xf32>
    %65 = vector.multi_reduction <add>, %64, %cst_35 [0] : vector<4x64xf32> to vector<64xf32>
    %66 = vector.shape_cast %65 : vector<64xf32> to vector<1x64xf32>
    %c0_36 = arith.constant 0 : index
    %c3_37 = arith.constant 3 : index
    %c0_38 = arith.constant 0 : index
    %67 = vector.load %arg5[%c0_36, %c3_37, %c0_38] : memref<1x8x64xf32, #tpu.memory_space<vmem>>, vector<1x1x64xf32>
    %68 = vector.shape_cast %67 : vector<1x1x64xf32> to vector<1x64xf32>
    %69 = vector.shape_cast %66 : vector<1x64xf32> to vector<1x1x64xf32>
    tpu.vector_store %arg5[%c0_36, %c3_37, %c0_38], %69 {strides = array<i32>} : memref<1x8x64xf32, #tpu.memory_space<vmem>>, vector<1x1x64xf32>,
    %c4 = arith.constant 4 : index
    %c0_39 = arith.constant 0 : index
    %c0_40 = arith.constant 0 : index
    %c0_41 = arith.constant 0 : index
    %70 = vector.load %arg3[%c4, %c0_39, %c0_40, %c0_41] : memref<8x4x4x64xf32, #tpu.memory_space<vmem>>, vector<1x4x4x64xf32>
    %71 = vector.shape_cast %70 : vector<1x4x4x64xf32> to vector<4x4x64xf32>
    %72 = arith.addf %1, %71 : vector<4x4x64xf32>
    %cst_42 = arith.constant dense<0xFF800000> : vector<4x64xf32>
    %73 = vector.multi_reduction <maximumf>, %72, %cst_42 [0] : vector<4x4x64xf32> to vector<4x64xf32>
    %74 = vector.shape_cast %73 : vector<4x64xf32> to vector<1x4x64xf32>
    %75 = vector.broadcast %74 : vector<1x4x64xf32> to vector<4x4x64xf32>
    %76 = arith.subf %72, %75 : vector<4x4x64xf32>
    %77 = math.exp %76 : vector<4x4x64xf32>
    %cst_43 = arith.constant dense<0.000000e+00> : vector<4x64xf32>
    %78 = vector.multi_reduction <add>, %77, %cst_43 [0] : vector<4x4x64xf32> to vector<4x64xf32>
    %79 = math.log %78 : vector<4x64xf32>
    %80 = vector.shape_cast %74 : vector<1x4x64xf32> to vector<4x64xf32>
    %81 = arith.addf %79, %80 : vector<4x64xf32>
    %cst_44 = arith.constant dense<0.000000e+00> : vector<64xf32>
    %82 = vector.multi_reduction <add>, %81, %cst_44 [0] : vector<4x64xf32> to vector<64xf32>
    %83 = vector.shape_cast %82 : vector<64xf32> to vector<1x64xf32>
    %c0_45 = arith.constant 0 : index
    %c4_46 = arith.constant 4 : index
    %c0_47 = arith.constant 0 : index
    %84 = vector.load %arg5[%c0_45, %c4_46, %c0_47] : memref<1x8x64xf32, #tpu.memory_space<vmem>>, vector<1x1x64xf32>
    %85 = vector.shape_cast %84 : vector<1x1x64xf32> to vector<1x64xf32>
    %86 = vector.shape_cast %83 : vector<1x64xf32> to vector<1x1x64xf32>
    tpu.vector_store %arg5[%c0_45, %c4_46, %c0_47], %86 {strides = array<i32>} : memref<1x8x64xf32, #tpu.memory_space<vmem>>, vector<1x1x64xf32>,
    %c5 = arith.constant 5 : index
    %c0_48 = arith.constant 0 : index
    %c0_49 = arith.constant 0 : index
    %c0_50 = arith.constant 0 : index
    %87 = vector.load %arg3[%c5, %c0_48, %c0_49, %c0_50] : memref<8x4x4x64xf32, #tpu.memory_space<vmem>>, vector<1x4x4x64xf32>
    %88 = vector.shape_cast %87 : vector<1x4x4x64xf32> to vector<4x4x64xf32>
    %89 = arith.addf %1, %88 : vector<4x4x64xf32>
    %cst_51 = arith.constant dense<0xFF800000> : vector<4x64xf32>
    %90 = vector.multi_reduction <maximumf>, %89, %cst_51 [0] : vector<4x4x64xf32> to vector<4x64xf32>
    %91 = vector.shape_cast %90 : vector<4x64xf32> to vector<1x4x64xf32>
    %92 = vector.broadcast %91 : vector<1x4x64xf32> to vector<4x4x64xf32>
    %93 = arith.subf %89, %92 : vector<4x4x64xf32>
    %94 = math.exp %93 : vector<4x4x64xf32>
    %cst_52 = arith.constant dense<0.000000e+00> : vector<4x64xf32>
    %95 = vector.multi_reduction <add>, %94, %cst_52 [0] : vector<4x4x64xf32> to vector<4x64xf32>
    %96 = math.log %95 : vector<4x64xf32>
    %97 = vector.shape_cast %91 : vector<1x4x64xf32> to vector<4x64xf32>
    %98 = arith.addf %96, %97 : vector<4x64xf32>
    %cst_53 = arith.constant dense<0.000000e+00> : vector<64xf32>
    %99 = vector.multi_reduction <add>, %98, %cst_53 [0] : vector<4x64xf32> to vector<64xf32>
    %100 = vector.shape_cast %99 : vector<64xf32> to vector<1x64xf32>
    %c0_54 = arith.constant 0 : index
    %c5_55 = arith.constant 5 : index
    %c0_56 = arith.constant 0 : index
    %101 = vector.load %arg5[%c0_54, %c5_55, %c0_56] : memref<1x8x64xf32, #tpu.memory_space<vmem>>, vector<1x1x64xf32>
    %102 = vector.shape_cast %101 : vector<1x1x64xf32> to vector<1x64xf32>
    %103 = vector.shape_cast %100 : vector<1x64xf32> to vector<1x1x64xf32>
    tpu.vector_store %arg5[%c0_54, %c5_55, %c0_56], %103 {strides = array<i32>} : memref<1x8x64xf32, #tpu.memory_space<vmem>>, vector<1x1x64xf32>,
    %c6 = arith.constant 6 : index
    %c0_57 = arith.constant 0 : index
    %c0_58 = arith.constant 0 : index
    %c0_59 = arith.constant 0 : index
    %104 = vector.load %arg3[%c6, %c0_57, %c0_58, %c0_59] : memref<8x4x4x64xf32, #tpu.memory_space<vmem>>, vector<1x4x4x64xf32>
    %105 = vector.shape_cast %104 : vector<1x4x4x64xf32> to vector<4x4x64xf32>
    %106 = arith.addf %1, %105 : vector<4x4x64xf32>
    %cst_60 = arith.constant dense<0xFF800000> : vector<4x64xf32>
    %107 = vector.multi_reduction <maximumf>, %106, %cst_60 [0] : vector<4x4x64xf32> to vector<4x64xf32>
    %108 = vector.shape_cast %107 : vector<4x64xf32> to vector<1x4x64xf32>
    %109 = vector.broadcast %108 : vector<1x4x64xf32> to vector<4x4x64xf32>
    %110 = arith.subf %106, %109 : vector<4x4x64xf32>
    %111 = math.exp %110 : vector<4x4x64xf32>
    %cst_61 = arith.constant dense<0.000000e+00> : vector<4x64xf32>
    %112 = vector.multi_reduction <add>, %111, %cst_61 [0] : vector<4x4x64xf32> to vector<4x64xf32>
    %113 = math.log %112 : vector<4x64xf32>
    %114 = vector.shape_cast %108 : vector<1x4x64xf32> to vector<4x64xf32>
    %115 = arith.addf %113, %114 : vector<4x64xf32>
    %cst_62 = arith.constant dense<0.000000e+00> : vector<64xf32>
    %116 = vector.multi_reduction <add>, %115, %cst_62 [0] : vector<4x64xf32> to vector<64xf32>
    %117 = vector.shape_cast %116 : vector<64xf32> to vector<1x64xf32>
    %c0_63 = arith.constant 0 : index
    %c6_64 = arith.constant 6 : index
    %c0_65 = arith.constant 0 : index
    %118 = vector.load %arg5[%c0_63, %c6_64, %c0_65] : memref<1x8x64xf32, #tpu.memory_space<vmem>>, vector<1x1x64xf32>
    %119 = vector.shape_cast %118 : vector<1x1x64xf32> to vector<1x64xf32>
    %120 = vector.shape_cast %117 : vector<1x64xf32> to vector<1x1x64xf32>
    tpu.vector_store %arg5[%c0_63, %c6_64, %c0_65], %120 {strides = array<i32>} : memref<1x8x64xf32, #tpu.memory_space<vmem>>, vector<1x1x64xf32>,
    %c7 = arith.constant 7 : index
    %c0_66 = arith.constant 0 : index
    %c0_67 = arith.constant 0 : index
    %c0_68 = arith.constant 0 : index
    %121 = vector.load %arg3[%c7, %c0_66, %c0_67, %c0_68] : memref<8x4x4x64xf32, #tpu.memory_space<vmem>>, vector<1x4x4x64xf32>
    %122 = vector.shape_cast %121 : vector<1x4x4x64xf32> to vector<4x4x64xf32>
    %123 = arith.addf %1, %122 : vector<4x4x64xf32>
    %cst_69 = arith.constant dense<0xFF800000> : vector<4x64xf32>
    %124 = vector.multi_reduction <maximumf>, %123, %cst_69 [0] : vector<4x4x64xf32> to vector<4x64xf32>
    %125 = vector.shape_cast %124 : vector<4x64xf32> to vector<1x4x64xf32>
    %126 = vector.broadcast %125 : vector<1x4x64xf32> to vector<4x4x64xf32>
    %127 = arith.subf %123, %126 : vector<4x4x64xf32>
    %128 = math.exp %127 : vector<4x4x64xf32>
    %cst_70 = arith.constant dense<0.000000e+00> : vector<4x64xf32>
    %129 = vector.multi_reduction <add>, %128, %cst_70 [0] : vector<4x4x64xf32> to vector<4x64xf32>
    %130 = math.log %129 : vector<4x64xf32>
    %131 = vector.shape_cast %125 : vector<1x4x64xf32> to vector<4x64xf32>
    %132 = arith.addf %130, %131 : vector<4x64xf32>
    %cst_71 = arith.constant dense<0.000000e+00> : vector<64xf32>
    %133 = vector.multi_reduction <add>, %132, %cst_71 [0] : vector<4x64xf32> to vector<64xf32>
    %134 = vector.shape_cast %133 : vector<64xf32> to vector<1x64xf32>
    %c0_72 = arith.constant 0 : index
    %c7_73 = arith.constant 7 : index
    %c0_74 = arith.constant 0 : index
    %135 = vector.load %arg5[%c0_72, %c7_73, %c0_74] : memref<1x8x64xf32, #tpu.memory_space<vmem>>, vector<1x1x64xf32>
    %136 = vector.shape_cast %135 : vector<1x1x64xf32> to vector<1x64xf32>
    %137 = vector.shape_cast %134 : vector<1x64xf32> to vector<1x1x64xf32>
    tpu.vector_store %arg5[%c0_72, %c7_73, %c0_74], %137 {strides = array<i32>} : memref<1x8x64xf32, #tpu.memory_space<vmem>>, vector<1x1x64xf32>,
    return
  }
  func.func @transform_0(%arg0: i32, %arg1: i32, %arg2: i32) -> (i32, i32, i32, i32) {
    %c0_i32 = arith.constant 0 : i32
    %c0_i32_0 = arith.constant 0 : i32
    %c0_i32_1 = arith.constant 0 : i32
    return %arg0, %c0_i32, %c0_i32_0, %arg1 : i32, i32, i32, i32
  }
  func.func @transform_1(%arg0: i32, %arg1: i32, %arg2: i32) -> (i32, i32, i32, i32) {
    %c0_i32 = arith.constant 0 : i32
    %c0_i32_0 = arith.constant 0 : i32
    %c0_i32_1 = arith.constant 0 : i32
    return %arg2, %c0_i32, %c0_i32_0, %arg1 : i32, i32, i32, i32
  }
  func.func @transform_2(%arg0: i32, %arg1: i32, %arg2: i32) -> (i32, i32, i32) {
    %c0_i32 = arith.constant 0 : i32
    return %arg2, %arg0, %arg1 : i32, i32, i32
  }
}

</mosaic_0001>

<bundles_post_ra>
// kernel: sum_prod_layer_forward.1
= control target key start
LH: loop header
LB: loop body
LE: loop exit
PB: predicated region body
PF: predicated region fallthrough
CT: control target
= control target key end

     0   :  { %s892_s9 = smov 0   ;;  %s894_s10 = smov 0   ;;  %s1283_s0 = inlined_call_operand.vmem [shape: f32[8,4,4,64], index: 0, kind: input, shape index: {}]   ;;  %s1284_s1 = inlined_call_operand.vmem [shape: f32[2,4,4,64], index: 1, kind: input, shape index: {}]   ;;  %s1285_s2 = inlined_call_operand.vmem [shape: f32[2,8,64], index: 2, kind: output, shape index: {}]  }
   0x1   :  { %s896_s11 = smov 0  }
   0x2 LB: > { %s24_s12 = sadd.s32 1, %s871_s10  ;;  %p714_p0 = scmp.ge.s32.totalorder %s875_s11, 1  ;;  %s875_s11 = sphi %s896_s11, %s12_s11   ;;  %s871_s10 = sphi %s894_s10, %s1287_s10   ;;  %s867_s9 = sphi %s892_s9, %s1286_s9  }
   0x3   : > { %p25_p1 = scmp.ge.s32.totalorder %s24_s12, 2  ;;  %p157_p2 = scmp.lt.s32.totalorder %s875_s11, 3 }
   0x5   : > { %s1289_s12 = smov (%p25_p1, %s24_s12), 0  ;;  %p158_p3 = pnand %p714_p0, %p157_p2 }
   0x6   : > { %p206_p4 = scmp.lt.s32.totalorder (!%p158_p3), %s867_s9, 1  ;;  %v228_v0 = vld [vmem:[%s1283_s0] sm:$0xf] (!%p158_p3)  ;;  %v229_v1 = vld [vmem:[%s1283_s0 + $0x4] sm:$0xf] (!%p158_p3)  ;;  %vm236_vm0 = vcmask (!%p158_p3), 519168  }
   0x7   : > { %161 = sbr.rel (%p158_p3) target bundleno = 137 (0x89), region = 28  ;;  %v230_v2 = vld [vmem:[%s1283_s0 + $0x8] sm:$0xf] (!%p158_p3)  ;;  %v231_v3 = vld [vmem:[%s1283_s0 + $0xc] sm:$0xf] (!%p158_p3)  ;;  %vm273_vm1 = vcmask (!%p158_p3), 516096  }
   0x8   : > { %v718_v4 = vld [vmem:[%s1283_s0 + $0x10] sm:$0xf] (!%p158_p3)  ;;  %v719_v5 = vld [vmem:[%s1283_s0 + $0x14] sm:$0xf] (!%p158_p3)  ;;  %v720_v6 = vld [vmem:[%s1283_s0 + $0x18] sm:$0xf] (!%p158_p3) }
   0x9   : > { %v721_v7 = vld [vmem:[%s1283_s0 + $0x1c] sm:$0xf] (!%p158_p3)  ;;  %v722_v16 = vld [vmem:[%s1283_s0 + $0x20] sm:$0xf] (!%p158_p3)  ;;  %v723_v21 = vld [vmem:[%s1283_s0 + $0x24] sm:$0xf] (!%p158_p3) }
   0xa   : > { %v724_v22 = vld [vmem:[%s1283_s0 + $0x28] sm:$0xf] (!%p158_p3)  ;;  %v725_v23 = vld [vmem:[%s1283_s0 + $0x2c] sm:$0xf] (!%p158_p3)  ;;  %v726_v28 = vld [vmem:[%s1283_s0 + $0x30] sm:$0xf] (!%p158_p3) }
   0xb   : > { %v727_v33 = vld [vmem:[%s1283_s0 + $0x34] sm:$0xf] (!%p158_p3)  ;;  %v728_v58 = vld [vmem:[%s1283_s0 + $0x38] sm:$0xf] (!%p158_p3)  ;;  %v729_v59 = vld [vmem:[%s1283_s0 + $0x3c] sm:$0xf] (!%p158_p3) }
   0xc   : > { %v730_v60 = vld [vmem:[%s1283_s0 + $0x40] sm:$0xf] (!%p158_p3) }
   0xe   : > { %s1291_s9 = smov (!%p206_p4, %s867_s9), 1 }
   0xf   : > { %s748_s19 = sshll.u32 %s1291_s9, 4  ;;  %s717_s5 = sshll.u32 %s1291_s9, 3 }
  0x10   : > { %s213_s26 = scalar_lea.vmem %s1284_s1, %s748_s19  ;;  %s1219_s7 = scalar_lea.vmem %s1285_s2, %s717_s5 }
  0x11   : > { %v940_v8 = vld [vmem:[%s213_s26] sm:$0xf]  ;;  %v942_v9 = vld [vmem:[%s213_s26 + $0x4] sm:$0xf]  ;;  %v944_v10 = vld [vmem:[%s213_s26 + $0x8] sm:$0xf] }
  0x12   : > { %v946_v11 = vld [vmem:[%s213_s26 + $0xc] sm:$0xf]  ;;  %v232_v12 = vadd.f32 %v228_v0, %v940_v8  ;;  %v233_v13 = vadd.f32 %v229_v1, %v942_v9  ;;  %v234_v14 = vadd.f32 %v230_v2, %v944_v10  ;;  %v280_v15 = vadd.f32 %v718_v4, %v940_v8 }
  0x13   : > { %v235_v17 = vadd.f32 %v231_v3, %v946_v11  ;;  %v281_v18 = vadd.f32 %v719_v5, %v942_v9  ;;  %v282_v19 = vadd.f32 %v720_v6, %v944_v10  ;;  %v283_v20 = vadd.f32 %v721_v7, %v946_v11 }
  0x14   : > { %v237_v24 = vsel %vm236_vm0, %v232_v12, -inf  ;;  %v238_v25 = vsel %vm236_vm0, %v233_v13, -inf  ;;  %v239_v26 = vsel %vm236_vm0, %v234_v14, -inf  ;;  %v284_v27 = vsel %vm236_vm0, %v280_v15, -inf }
  0x15   : > { %v240_v29 = vsel %vm236_vm0, %v235_v17, -inf  ;;  %v241_v30 = vmax.f32 %v237_v24, %v238_v25  ;;  %v285_v31 = vsel %vm236_vm0, %v281_v18, -inf  ;;  %v286_v32 = vsel %vm236_vm0, %v282_v19, -inf }
  0x16   : > { %v242_v34 = vmax.f32 %v239_v26, %v240_v29  ;;  %v287_v35 = vsel %vm236_vm0, %v283_v20, -inf  ;;  %v288_v36 = vmax.f32 %v284_v27, %v285_v31  ;;  %v326_v37 = vadd.f32 %v722_v16, %v940_v8  ;;  %v733_v26 = vld [vmem:[%s1283_s0 + $0x4c] sm:$0xf]  ;;  %v734_v27 = vld [vmem:[%s1283_s0 + $0x50] sm:$0xf] }
  0x17   : > { %v289_v38 = vmax.f32 %v286_v32, %v287_v35  ;;  %v327_v39 = vadd.f32 %v723_v21, %v942_v9  ;;  %v328_v40 = vadd.f32 %v724_v22, %v944_v10  ;;  %v329_v41 = vadd.f32 %v725_v23, %v946_v11  ;;  %v731_v21 = vld [vmem:[%s1283_s0 + $0x44] sm:$0xf]  ;;  %v732_v22 = vld [vmem:[%s1283_s0 + $0x48] sm:$0xf] }
  0x18   : > { %v986_v42 = vmax.f32 %v241_v30, %v242_v34  ;;  %v330_v43 = vsel %vm236_vm0, %v326_v37, -inf  ;;  %v990_v44 = vadd.f32 %v726_v28, %v940_v8  ;;  %v993_v45 = vadd.f32 %v727_v33, %v942_v9 }
  0x19   : > { %v995_v46 = vmax.f32 %v288_v36, %v289_v38  ;;  %v331_v47 = vsel %vm236_vm0, %v327_v39, -inf  ;;  %v332_v48 = vsel %vm236_vm0, %v328_v40, -inf  ;;  %v333_v49 = vsel %vm236_vm0, %v329_v41, -inf }
  0x1a   : > { %v244_v50 = vsub.f32 %v232_v12, %v986_v42  ;;  %v245_v51 = vsub.f32 %v233_v13, %v986_v42  ;;  %v246_v52 = vsub.f32 %v234_v14, %v986_v42  ;;  %v247_v53 = vsub.f32 %v235_v17, %v986_v42 }
  0x1b   : > { %v291_v54 = vsub.f32 %v280_v15, %v995_v46  ;;  %v292_v55 = vsub.f32 %v281_v18, %v995_v46  ;;  %v293_v56 = vsub.f32 %v282_v19, %v995_v46  ;;  %v294_v57 = vsub.f32 %v283_v20, %v995_v46 }
  0x1c   : > { %v248_v61 = vmul.f32 1.442695, %v244_v50  ;;  %v250_v62 = vmul.f32 1.442695, %v245_v51  ;;  %v252_v63 = vmul.f32 1.442695, %v246_v52  ;;  %v334_v0 = vmax.f32 %v330_v43, %v331_v47 }
  0x1d   : > { %v254_v1 = vmul.f32 1.442695, %v247_v53  ;;  %v295_v2 = vmul.f32 1.442695, %v291_v54  ;;  %v297_v3 = vmul.f32 1.442695, %v292_v55  ;;  %v335_v4 = vmax.f32 %v332_v48, %v333_v49 }
  0x1e   : > { %773 = vpow2.f32 %v248_v61  ;;  %v299_v5 = vmul.f32 1.442695, %v293_v56  ;;  %v301_v6 = vmul.f32 1.442695, %v294_v57  ;;  %v374_v7 = vadd.f32 %v728_v58, %v944_v10  ;;  %v735_v47 = vld [vmem:[%s1283_s0 + $0x54] sm:$0xf] }
  0x1f   : > { %775 = vpow2.f32 %v250_v62  ;;  %v1018_v12 = vmax.f32 %v334_v0, %v335_v4  ;;  %v375_v13 = vadd.f32 %v729_v59, %v946_v11  ;;  %v376_v14 = vsel %vm236_vm0, %v990_v44, -inf  ;;  %v736_v56 = vld [vmem:[%s1283_s0 + $0x58] sm:$0xf] }
  0x20   : > { %777 = vpow2.f32 %v252_v63  ;;  %v377_v15 = vsel %vm236_vm0, %v993_v45, -inf  ;;  %v378_v16 = vsel %vm236_vm0, %v374_v7, -inf  ;;  %v1027_v17 = vadd.f32 %v730_v60, %v940_v8 }
  0x21   : > { %779 = vpow2.f32 %v254_v1  ;;  %v337_v18 = vsub.f32 %v326_v37, %v1018_v12  ;;  %v338_v19 = vsub.f32 %v327_v39, %v1018_v12  ;;  %v339_v20 = vsub.f32 %v328_v40, %v1018_v12 }
  0x22   : > { %781 = vpow2.f32 %v295_v2  ;;  %v340_v23 = vsub.f32 %v329_v41, %v1018_v12  ;;  %v379_v24 = vsel %vm236_vm0, %v375_v13, -inf  ;;  %v380_v25 = vmax.f32 %v376_v14, %v377_v15 }
  0x23   : > { %783 = vpow2.f32 %v297_v3  ;;  %v341_v28 = vmul.f32 1.442695, %v337_v18  ;;  %v343_v29 = vmul.f32 1.442695, %v338_v19  ;;  %v345_v30 = vmul.f32 1.442695, %v339_v20 }
  0x24   : > { %785 = vpow2.f32 %v299_v5  ;;  %v347_v31 = vmul.f32 1.442695, %v340_v23  ;;  %v381_v32 = vmax.f32 %v378_v16, %v379_v24  ;;  %v1047_v33 = vadd.f32 %v731_v21, %v942_v9 }
  0x25   : > { %787 = vpow2.f32 %v301_v6  ;;  %v1050_v34 = vadd.f32 %v732_v22, %v944_v10  ;;  %v1053_v35 = vadd.f32 %v733_v26, %v946_v11  ;;  %v422_v36 = vsel %vm236_vm0, %v1027_v17, -inf }
  0x26   : > { %789 = vpow2.f32 %v341_v28  ;;  %v1057_v37 = vmax.f32 %v380_v25, %v381_v32  ;;  %v423_v38 = vsel %vm236_vm0, %v1047_v33, -inf  ;;  %v1062_v39 = vadd.f32 %v734_v27, %v940_v8 }
  0x27   : > { %791 = vpow2.f32 %v343_v29  ;;  %v424_v40 = vsel %vm236_vm0, %v1050_v34, -inf  ;;  %v425_v41 = vsel %vm236_vm0, %v1053_v35, -inf  ;;  %v426_v43 = vmax.f32 %v422_v36, %v423_v38 }
  0x28   : > { %v774_v48 = vpop.eup %773  ;;  %793 = vpow2.f32 %v345_v30  ;;  %v383_v49 = vsub.f32 %v990_v44, %v1057_v37  ;;  %v384_v50 = vsub.f32 %v993_v45, %v1057_v37  ;;  %v385_v51 = vsub.f32 %v374_v7, %v1057_v37  ;;  %v737_v44 = vld [vmem:[%s1283_s0 + $0x5c] sm:$0xf] }
  0x29   : > { %v776_v52 = vpop.eup %775  ;;  %v256_v53 = vsel %vm236_vm0, %v774_v48, 0.0  ;;  %795 = vpow2.f32 %v347_v31  ;;  %v386_v54 = vsub.f32 %v375_v13, %v1057_v37  ;;  %v427_v55 = vmax.f32 %v424_v40, %v425_v41 }
  0x2a   : > { %v778_v57 = vpop.eup %777  ;;  %v257_v45 = vsel %vm236_vm0, %v776_v52, 0.0  ;;  %v387_v58 = vmul.f32 1.442695, %v383_v49  ;;  %v389_v59 = vmul.f32 1.442695, %v384_v50  ;;  %v1086_v60 = vadd.f32 %v735_v47, %v942_v9 }
  0x2b   : > { %v780_v61 = vpop.eup %779  ;;  %v258_v62 = vadd.f32 %v257_v45, %v256_v53  ;;  %v259_v63 = vsel %vm236_vm0, %v778_v57, 0.0  ;;  %v391_v0 = vmul.f32 1.442695, %v385_v51  ;;  %v393_v1 = vmul.f32 1.442695, %v386_v54 }
  0x2c   : > { %v782_v2 = vpop.eup %781  ;;  %v261_v3 = vsel %vm236_vm0, %v780_v61, 0.0  ;;  %797 = vpow2.f32 %v387_v58  ;;  %v1090_v4 = vmax.f32 %v426_v43, %v427_v55  ;;  %v1093_v5 = vadd.f32 %v736_v56, %v944_v10  ;;  %v739_v47 = vld [vmem:[%s1283_s0 + $0x64] sm:$0xf]  ;;  %v740_v51 = vld [vmem:[%s1283_s0 + $0x68] sm:$0xf] }
  0x2d   : > { %v784_v6 = vpop.eup %783  ;;  %v260_v7 = vadd.f32 %v259_v63, %v258_v62  ;;  %v303_v13 = vsel %vm236_vm0, %v782_v2, 0.0  ;;  %799 = vpow2.f32 %v389_v59  ;;  %v1097_v14 = vadd.f32 %v737_v44, %v946_v11  ;;  %v741_v55 = vld [vmem:[%s1283_s0 + $0x6c] sm:$0xf] }
  0x2e   : > { %v786_v15 = vpop.eup %785  ;;  %v304_v16 = vsel %vm236_vm0, %v784_v6, 0.0  ;;  %801 = vpow2.f32 %v391_v0  ;;  %v429_v18 = vsub.f32 %v1027_v17, %v1090_v4  ;;  %v430_v19 = vsub.f32 %v1047_v33, %v1090_v4 }
  0x2f   : > { %v788_v20 = vpop.eup %787  ;;  %v262_v21 = vadd.f32 %v261_v3, %v260_v7  ;;  %v305_v22 = vadd.f32 %v304_v16, %v303_v13  ;;  %v306_v23 = vsel %vm236_vm0, %v786_v15, 0.0  ;;  %803 = vpow2.f32 %v393_v1 }
  0x30   : > { %v790_v24 = vpop.eup %789  ;;  %v308_v25 = vsel %vm236_vm0, %v788_v20, 0.0  ;;  %v431_v26 = vsub.f32 %v1050_v34, %v1090_v4  ;;  %v432_v27 = vsub.f32 %v1053_v35, %v1090_v4  ;;  %v433_v28 = vmul.f32 1.442695, %v429_v18  ;;  %v738_v35 = vld [vmem:[%s1283_s0 + $0x60] sm:$0xf] }
  0x31   : > { %v792_v17 = vpop.eup %791  ;;  %805 = vlog2.f32 %v262_v21  ;;  %v307_v29 = vadd.f32 %v306_v23, %v305_v22  ;;  %v349_v30 = vsel %vm236_vm0, %v790_v24, 0.0  ;;  %v435_v31 = vmul.f32 1.442695, %v430_v19 }
  0x32   : > { %v794_v32 = vpop.eup %793  ;;  %v350_v33 = vsel %vm236_vm0, %v792_v17, 0.0  ;;  %807 = vpow2.f32 %v433_v28  ;;  %v437_v36 = vmul.f32 1.442695, %v431_v26  ;;  %v439_v38 = vmul.f32 1.442695, %v432_v27 }
  0x33   : > { %v796_v40 = vpop.eup %795  ;;  %v309_v41 = vadd.f32 %v308_v25, %v307_v29  ;;  %v351_v43 = vadd.f32 %v350_v33, %v349_v30  ;;  %v352_v34 = vsel %vm236_vm0, %v794_v32, 0.0  ;;  %809 = vpow2.f32 %v435_v31 }
  0x34   : > { %v354_v48 = vsel %vm236_vm0, %v796_v40, 0.0  ;;  %811 = vpow2.f32 %v437_v36  ;;  %v468_v49 = vsel %vm236_vm0, %v1062_v39, -inf  ;;  %v469_v50 = vsel %vm236_vm0, %v1086_v60, -inf }
  0x35   : > { %813 = vlog2.f32 %v309_v41  ;;  %v353_v52 = vadd.f32 %v352_v34, %v351_v43  ;;  %v470_v53 = vsel %vm236_vm0, %v1093_v5, -inf  ;;  %v471_v54 = vsel %vm236_vm0, %v1097_v14, -inf }
  0x36   : > { %v798_v56 = vpop.eup %797  ;;  %815 = vpow2.f32 %v439_v38  ;;  %v472_v44 = vmax.f32 %v468_v49, %v469_v50  ;;  %v473_v57 = vmax.f32 %v470_v53, %v471_v54  ;;  %v1135_v45 = vadd.f32 %v738_v35, %v940_v8  ;;  %v743_v53 = vld [vmem:[%s1283_s0 + $0x74] sm:$0xf] }
  0x37   : > { %v800_v58 = vpop.eup %799  ;;  %v355_v59 = vadd.f32 %v354_v48, %v353_v52  ;;  %v395_v61 = vsel %vm236_vm0, %v798_v56, 0.0  ;;  %v1139_v62 = vadd.f32 %v739_v47, %v942_v9  ;;  %v1142_v63 = vadd.f32 %v740_v51, %v944_v10 }
  0x38   : > { %v802_v0 = vpop.eup %801  ;;  %v396_v1 = vsel %vm236_vm0, %v800_v58, 0.0  ;;  %v1145_v2 = vmax.f32 %v472_v44, %v473_v57  ;;  %v1148_v3 = vadd.f32 %v741_v55, %v946_v11  ;;  %v514_v6 = vsel %vm236_vm0, %v1135_v45, -inf }
  0x39   : > { %v804_v7 = vpop.eup %803  ;;  %817 = vlog2.f32 %v355_v59  ;;  %v397_v13 = vadd.f32 %v396_v1, %v395_v61  ;;  %v398_v15 = vsel %vm236_vm0, %v802_v0, 0.0  ;;  %v515_v16 = vsel %vm236_vm0, %v1139_v62, -inf }
  0x3a   : > { %v400_v18 = vsel %vm236_vm0, %v804_v7, 0.0  ;;  %v475_v19 = vsub.f32 %v1062_v39, %v1145_v2  ;;  %v476_v20 = vsub.f32 %v1086_v60, %v1145_v2  ;;  %v477_v21 = vsub.f32 %v1093_v5, %v1145_v2  ;;  %v742_v39 = vld [vmem:[%s1283_s0 + $0x70] sm:$0xf] }
  0x3b   : > { %v806_v22 = vpop.eup %805  ;;  %v399_v23 = vadd.f32 %v398_v15, %v397_v13  ;;  %v478_v24 = vsub.f32 %v1097_v14, %v1145_v2  ;;  %v516_v25 = vsel %vm236_vm0, %v1142_v63, -inf  ;;  %v517_v26 = vsel %vm236_vm0, %v1148_v3, -inf }
  0x3c   : > { %v808_v27 = vpop.eup %807  ;;  %v264_v60 = vmul.f32 0.6931472, %v806_v22  ;;  %v479_v28 = vmul.f32 1.442695, %v475_v19  ;;  %v481_v17 = vmul.f32 1.442695, %v476_v20  ;;  %v518_v5 = vmax.f32 %v514_v6, %v515_v16 }
  0x3d   : > { %v810_v29 = vpop.eup %809  ;;  %v401_v30 = vadd.f32 %v400_v18, %v399_v23  ;;  %v441_v31 = vsel %vm236_vm0, %v808_v27, 0.0  ;;  %v483_v14 = vmul.f32 1.442695, %v477_v21  ;;  %v485_v32 = vmul.f32 1.442695, %v478_v24 }
  0x3e   : > { %v812_v33 = vpop.eup %811  ;;  %v265_v36 = vadd.f32 %v264_v60, %v986_v42  ;;  %v442_v38 = vsel %vm236_vm0, %v810_v29, 0.0  ;;  %819 = vpow2.f32 %v479_v28  ;;  %v519_v40 = vmax.f32 %v516_v25, %v517_v26 }
  0x3f   : > { %v814_v41 = vpop.eup %813  ;;  %821 = vlog2.f32 %v401_v30  ;;  %v443_v43 = vadd.f32 %v442_v38, %v441_v31  ;;  %v444_v34 = vsel %vm236_vm0, %v812_v33, 0.0  ;;  %v1176_v35 = vadd.f32 %v742_v39, %v940_v8 }
  0x40   : > { %v816_v47 = vpop.eup %815  ;;  %v266_v48 = vsel %vm236_vm0, %v265_v36, 0.0  ;;  %v311_v49 = vmul.f32 0.6931472, %v814_v41  ;;  %823 = vpow2.f32 %v481_v17  ;;  %v1179_v50 = vmax.f32 %v518_v5, %v519_v40 }
  0x41   : > { %v267_v42 = vrot.slane %v266_v48, 4  ;;  %v445_v51 = vadd.f32 %v444_v34, %v443_v43  ;;  %v446_v52 = vsel %vm236_vm0, %v816_v47, 0.0  ;;  %825 = vpow2.f32 %v483_v14 }
  0x42   : > { %v312_v8 = vadd.f32 %v311_v49, %v995_v46  ;;  %827 = vpow2.f32 %v485_v32  ;;  %v521_v54 = vsub.f32 %v1135_v45, %v1179_v50  ;;  %v522_v55 = vsub.f32 %v1139_v62, %v1179_v50  ;;  %v744_v46 = vld [vmem:[%s1283_s0 + $0x78] sm:$0xf] }
  0x43   : > { %v818_v56 = vpop.eup %817  ;;  %v268_v44 = vadd.f32 %v267_v42, %v266_v48  ;;  %v447_v57 = vadd.f32 %v446_v52, %v445_v51  ;;  %v523_v58 = vsub.f32 %v1142_v63, %v1179_v50  ;;  %v524_v59 = vsub.f32 %v1148_v3, %v1179_v50  ;;  %v745_v63 = vld [vmem:[%s1283_s0 + $0x7c] sm:$0xf] }
  0x44   : > { %v313_v61 = vsel %vm236_vm0, %v312_v8, 0.0  ;;  %v357_v45 = vmul.f32 0.6931472, %v818_v56  ;;  %v525_v0 = vmul.f32 1.442695, %v521_v54  ;;  %v1199_v62 = vadd.f32 %v743_v53, %v942_v9 }
  0x45   : > { %v269_v1 = vrot.slane %v268_v44, 2  ;;  %v314_v6 = vrot.slane %v313_v61, 4  ;;  %829 = vlog2.f32 %v447_v57  ;;  %v527_v7 = vmul.f32 1.442695, %v522_v55 }
  0x46   : > { %v358_v3 = vadd.f32 %v357_v45, %v1018_v12  ;;  %831 = vpow2.f32 %v525_v0  ;;  %v529_v13 = vmul.f32 1.442695, %v523_v58  ;;  %v531_v15 = vmul.f32 1.442695, %v524_v59 }
  0x47   : > { %v270_v16 = vadd.f32 %v269_v1, %v268_v44  ;;  %v315_v18 = vadd.f32 %v314_v6, %v313_v61  ;;  %833 = vpow2.f32 %v527_v7  ;;  %v1207_v9 = vadd.f32 %v744_v46, %v944_v10 }
  0x48   : > { %v820_v19 = vpop.eup %819  ;;  %v359_v20 = vsel %vm236_vm0, %v358_v3, 0.0  ;;  %835 = vpow2.f32 %v529_v13  ;;  %v1211_v21 = vadd.f32 %v745_v63, %v946_v11  ;;  %v560_v12 = vsel %vm236_vm0, %v1176_v35, -inf }
  0x49   : > { %v822_v22 = vpop.eup %821  ;;  %v271_v23 = vrot.slane %v270_v16, 1  ;;  %v316_v24 = vrot.slane %v315_v18, 2  ;;  %v360_v25 = vrot.slane %v359_v20, 4  ;;  %v487_v26 = vsel %vm236_vm0, %v820_v19, 0.0 }
  0x4a   : > { %v824_v39 = vpop.eup %823  ;;  %v403_v10 = vmul.f32 0.6931472, %v822_v22  ;;  %837 = vpow2.f32 %v531_v15  ;;  %v561_v11 = vsel %vm236_vm0, %v1199_v62, -inf  ;;  %v562_v27 = vsel %vm236_vm0, %v1207_v9, -inf }
  0x4b   : > { %v826_v60 = vpop.eup %825  ;;  %v272_v28 = vadd.f32 %v271_v23, %v270_v16  ;;  %v317_v17 = vadd.f32 %v316_v24, %v315_v18  ;;  %v361_v5 = vadd.f32 %v360_v25, %v359_v20  ;;  %v488_v29 = vsel %vm236_vm0, %v824_v39, 0.0 }
  0x4c   : > { %v828_v30 = vpop.eup %827  ;;  %v404_v31 = vadd.f32 %v403_v10, %v1057_v37  ;;  %v489_v14 = vadd.f32 %v488_v29, %v487_v26  ;;  %v490_v32 = vsel %vm236_vm0, %v826_v60, 0.0  ;;  %v563_v33 = vsel %vm236_vm0, %v1211_v21, -inf }
  0x4d   : > { %274 = vst.msk [vmem:[%s1219_s7] sm:$0x1] %vm273_vm1, %v272_v28  ;;  %v318_v36 = vrot.slane %v317_v17, 1  ;;  %v362_v38 = vrot.slane %v361_v5, 2  ;;  %v492_v40 = vsel %vm236_vm0, %v828_v30, 0.0  ;;  %v564_v41 = vmax.f32 %v560_v12, %v561_v11 }
  0x4e   : > { %v405_v43 = vsel %vm236_vm0, %v404_v31, 0.0  ;;  %v491_v34 = vadd.f32 %v490_v32, %v489_v14  ;;  %v565_v47 = vmax.f32 %v562_v27, %v563_v33 }
  0x4f   : > { %v830_v48 = vpop.eup %829  ;;  %v319_v37 = vadd.f32 %v318_v36, %v317_v17  ;;  %v363_v49 = vadd.f32 %v362_v38, %v361_v5  ;;  %v406_v42 = vrot.slane %v405_v43, 4 }
  0x50   : > { %v832_v51 = vpop.eup %831  ;;  %v449_v52 = vmul.f32 0.6931472, %v830_v48  ;;  %v493_v53 = vadd.f32 %v492_v40, %v491_v34  ;;  %v1234_v8 = vmax.f32 %v564_v41, %v565_v47 }
  0x51   : > { %v834_v54 = vpop.eup %833  ;;  %320 = vst.msk [vmem:[%s1219_s7 + $0x1] sm:$0x1] %vm273_vm1, %v319_v37  ;;  %v364_v55 = vrot.slane %v363_v49, 1  ;;  %v407_v56 = vadd.f32 %v406_v42, %v405_v43  ;;  %v533_v44 = vsel %vm236_vm0, %v832_v51, 0.0 }
  0x52   : > { %v836_v57 = vpop.eup %835  ;;  %v450_v58 = vadd.f32 %v449_v52, %v1090_v4  ;;  %839 = vlog2.f32 %v493_v53  ;;  %v534_v59 = vsel %vm236_vm0, %v834_v54, 0.0  ;;  %v567_v46 = vsub.f32 %v1176_v35, %v1234_v8 }
  0x53   : > { %v365_v61 = vadd.f32 %v364_v55, %v363_v49  ;;  %v408_v45 = vrot.slane %v407_v56, 2  ;;  %v535_v0 = vadd.f32 %v534_v59, %v533_v44  ;;  %v536_v1 = vsel %vm236_vm0, %v836_v57, 0.0 }
  0x54   : > { %v838_v6 = vpop.eup %837  ;;  %v451_v7 = vsel %vm236_vm0, %v450_v58, 0.0  ;;  %v568_v63 = vsub.f32 %v1199_v62, %v1234_v8  ;;  %v569_v4 = vsub.f32 %v1207_v9, %v1234_v8  ;;  %v570_v3 = vsub.f32 %v1211_v21, %v1234_v8 }
  0x55   : > { %366 = vst.msk [vmem:[%s1219_s7 + $0x2] sm:$0x1] %vm273_vm1, %v365_v61  ;;  %v409_v35 = vadd.f32 %v408_v45, %v407_v56  ;;  %v452_v13 = vrot.slane %v451_v7, 4  ;;  %v537_v15 = vadd.f32 %v536_v1, %v535_v0  ;;  %v538_v16 = vsel %vm236_vm0, %v838_v6, 0.0 }
  0x56   : > { %v571_v18 = vmul.f32 1.442695, %v567_v46  ;;  %v573_v19 = vmul.f32 1.442695, %v568_v63  ;;  %v575_v62 = vmul.f32 1.442695, %v569_v4 }
  0x57   : > { %v410_v20 = vrot.slane %v409_v35, 1  ;;  %v453_v12 = vadd.f32 %v452_v13, %v451_v7  ;;  %v539_v22 = vadd.f32 %v538_v16, %v537_v15  ;;  %v577_v9 = vmul.f32 1.442695, %v570_v3 }
  0x58   : > { %841 = vpow2.f32 %v571_v18 }
  0x59   : > { %v411_v23 = vadd.f32 %v410_v20, %v409_v35  ;;  %v454_v24 = vrot.slane %v453_v12, 2  ;;  %843 = vlog2.f32 %v539_v22 }
  0x5a   : > { %845 = vpow2.f32 %v573_v19 }
  0x5b   : > { %412 = vst.msk [vmem:[%s1219_s7 + $0x3] sm:$0x1] %vm273_vm1, %v411_v23  ;;  %v455_v21 = vadd.f32 %v454_v24, %v453_v12  ;;  %847 = vpow2.f32 %v575_v62 }
  0x5c   : > { %v840_v25 = vpop.eup %839  ;;  %849 = vpow2.f32 %v577_v9 }
  0x5d   : > { %v456_v26 = vrot.slane %v455_v21, 1  ;;  %v495_v39 = vmul.f32 0.6931472, %v840_v25 }
  0x5f   : > { %v457_v10 = vadd.f32 %v456_v26, %v455_v21  ;;  %v496_v11 = vadd.f32 %v495_v39, %v1145_v2 }
  0x61   : > { %458 = vst.msk [vmem:[%s1219_s7 + $0x4] sm:$0x1] %vm273_vm1, %v457_v10  ;;  %v497_v27 = vsel %vm236_vm0, %v496_v11, 0.0 }
  0x62   : > { %v842_v60 = vpop.eup %841  ;;  %v498_v28 = vrot.slane %v497_v27, 4 }
  0x63   : > { %v844_v17 = vpop.eup %843  ;;  %v579_v5 = vsel %vm236_vm0, %v842_v60, 0.0 }
  0x64   : > { %v846_v29 = vpop.eup %845  ;;  %v499_v30 = vadd.f32 %v498_v28, %v497_v27  ;;  %v541_v31 = vmul.f32 0.6931472, %v844_v17 }
  0x65   : > { %v848_v14 = vpop.eup %847  ;;  %v580_v32 = vsel %vm236_vm0, %v846_v29, 0.0 }
  0x66   : > { %v850_v33 = vpop.eup %849  ;;  %v500_v36 = vrot.slane %v499_v30, 2  ;;  %v542_v2 = vadd.f32 %v541_v31, %v1179_v50  ;;  %v581_v38 = vadd.f32 %v580_v32, %v579_v5  ;;  %v582_v40 = vsel %vm236_vm0, %v848_v14, 0.0 }
  0x67   : > { %v584_v41 = vsel %vm236_vm0, %v850_v33, 0.0 }
  0x68   : > { %v501_v43 = vadd.f32 %v500_v36, %v499_v30  ;;  %v543_v34 = vsel %vm236_vm0, %v542_v2, 0.0  ;;  %v583_v47 = vadd.f32 %v582_v40, %v581_v38 }
  0x69   : > { %v544_v48 = vrot.slane %v543_v34, 4 }
  0x6a   : > { %v502_v37 = vrot.slane %v501_v43, 1  ;;  %v585_v49 = vadd.f32 %v584_v41, %v583_v47 }
  0x6b   : > { %v545_v42 = vadd.f32 %v544_v48, %v543_v34 }
  0x6c   : > { %v503_v51 = vadd.f32 %v502_v37, %v501_v43  ;;  %851 = vlog2.f32 %v585_v49 }
  0x6d   : > { %v546_v52 = vrot.slane %v545_v42, 2 }
  0x6e   : > { %504 = vst.msk [vmem:[%s1219_s7 + $0x5] sm:$0x1] %vm273_vm1, %v503_v51 }
  0x6f   : > { %v547_v50 = vadd.f32 %v546_v52, %v545_v42 }
  0x71   : > { %v548_v53 = vrot.slane %v547_v50, 1 }
  0x73   : > { %v549_v54 = vadd.f32 %v548_v53, %v547_v50 }
  0x75   : > { %550 = vst.msk [vmem:[%s1219_s7 + $0x6] sm:$0x1] %vm273_vm1, %v549_v54 }
  0x76   : > { %v852_v55 = vpop.eup %851 }
  0x77   : > { %v587_v56 = vmul.f32 0.6931472, %v852_v55 }
  0x79   : > { %v588_v44 = vadd.f32 %v587_v56, %v1234_v8 }
  0x7b   : > { %v589_v57 = vsel %vm236_vm0, %v588_v44, 0.0 }
  0x7c   : > { %v590_v58 = vrot.slane %v589_v57, 4 }
  0x7e   : > { %v591_v59 = vadd.f32 %v590_v58, %v589_v57 }
  0x80   : > { %v592_v46 = vrot.slane %v591_v59, 2 }
  0x82   : > { %v593_v61 = vadd.f32 %v592_v46, %v591_v59 }
  0x84   : > { %v594_v45 = vrot.slane %v593_v61, 1 }
  0x86   : > { %v595_v0 = vadd.f32 %v594_v45, %v593_v61 }
  0x88   : > { %596 = vst.msk [vmem:[%s1219_s7 + $0x7] sm:$0x1] %vm273_vm1, %v595_v0 }
  0x89 PF: > { %s12_s11 = sadd.s32 1, %s875_s11   ;;  %s1286_s9 = smov %s871_s10 }
  0x8a   : > { %p9_p5 = scmp.ge.s32.totalorder %s12_s11, 4   ;;  %s1287_s10 = smov %s1289_s12 }
  0x8c   :  { %11 = sbr.rel (!%p9_p5) target bundleno = 2 (0x2), region = 68 }

</bundles_post_ra>
